<compile_context>
chip_gen: v7x
topology: tpu7x:2x2x1
jax: 0.10.0
libtpu: 0.0.40
codegen_flags: <defaults>
</compile_context>

<pallas_src>
import functools

import jax
import jax.numpy as jnp
from jax.experimental import pallas as pl
from jax.experimental.pallas import tpu as pltpu

# Lane widths tried for the interleaved slab (widest first).  All are multiples
# of 128 (unmasked vst) and even (a complex (re, im) pair never splits rows).
_COL_CANDIDATES = (2048, 1024, 512, 256, 128)
_TARGET_BLOCK_BYTES = 4 << 20    # ~4 MiB DMA block per array
_TARGET_CHUNK_BYTES = 512 << 10  # ~512 KiB compute chunk inside the kernel
_VMEM_LIMIT_BYTES = 32 << 20     # lifts v5e's 16 MiB default; <= physical on every gen
_SMALL_INPUT_ELEMS = 1 << 16     # below this many complex elems, plain XLA wins


def _round_up(x: int, m: int) -> int:
    return ((x + m - 1) // m) * m


def _cv_siglog_kernel(y_ref, o_ref, *, c, r, chunk_rows):
    """y_ref / o_ref: (block_rows, cols) f32, lanes interleaved re0,im0,re1,im1,..."""
    block_rows, cols = y_ref.shape
    num_chunks = block_rows // chunk_rows
    cr = c * r  # folded at trace time

    # Hoisted out of the loop (JAX does not CSE broadcast_in_dim):
    # even lane -> real part, odd lane -> imag part.
    lane = jax.lax.broadcasted_iota(jnp.int32, (chunk_rows, cols), 1)
    is_even_lane = (lane & 1) == 0

    def body(i, carry):
        row0 = pl.multiple_of(i * chunk_rows, chunk_rows)
        y = y_ref[pl.ds(row0, chunk_rows), :]
        y2 = y * y
        # Pair-sum |z|^2 without de-interleaving: every lane adds its partner's
        # square.  roll(shift=cols-1) brings lane l+1 into lane l (partner of the
        # even lanes); roll(shift=1) brings lane l-1 into lane l (partner of the
        # odd lanes).  The wrapped-around lanes are never selected, so there is
        # no cross-pair leakage.
        partner_even = pltpu.roll(y2, shift=cols - 1, axis=1)
        partner_odd = pltpu.roll(y2, shift=1, axis=1)
        mag2 = y2 + jnp.where(is_even_lane, partner_even, partner_odd)
        mag = jnp.sqrt(mag2)
        # 1/(c + mag/r) == r * 1/(c*r + mag).  Exact reciprocal on purpose.
        scale = r * pl.reciprocal(cr + mag, approx=False)
        o_ref[pl.ds(row0, chunk_rows), :] = y * scale
        return carry

    jax.lax.fori_loop(0, num_chunks, body, 0)


@functools.partial(jax.jit, static_argnames=("c", "r", "min_pallas_elems"))
def cv_siglog(x: jax.Array, c: float = 1.0, r: float = 1.0,
              *, min_pallas_elems: int = _SMALL_INPUT_ELEMS) -> jax.Array:
    """Complex-valued SigLog activation x / (c + |x| / r) via a Pallas TPU kernel."""
    x = jnp.asarray(x)
    if x.dtype != jnp.complex64:
        x = x.astype(jnp.complex64)
    orig_shape = x.shape
    n = x.size
    c = float(c)
    r = float(r)

    if n == 0 or n < min_pallas_elems:
        # Kernel launch + complex<->f32 layout plumbing dominates small tensors.
        return x / (c + jnp.abs(x) / r)

    flat2 = 2 * n  # number of f32 scalars in the interleaved view

    # Interleaved f32 "view" of x: (re0, im0, re1, im1, ...).  lax.bitcast_convert_type
    # does not support complex dtypes, so this fused stack (one sequential read+write
    # of the tensor) is the cheapest way in/out of the f32 domain available in JAX.
    y = jnp.stack([jnp.real(x), jnp.imag(x)], axis=-1).reshape(-1)

    # Widest lane count that divides the data exactly (no pad copy); pad only if
    # nothing divides, kept adjacent to the stack so it can fuse.
    cols = next((cw for cw in _COL_CANDIDATES if flat2 % cw == 0), None)
    pad = 0
    if cols is None:
        cols = _COL_CANDIDATES[-1]
        pad = (-flat2) % cols
        y = jnp.pad(y, (0, pad))  # padded zeros are sliced off below (c > 0 => no NaN)
    rows = (flat2 + pad) // cols
    slab = y.reshape(rows, cols)

    # Compute chunk (~512 KiB) bounds in-kernel intermediates / spills.
    chunk_rows = max(8, min(_TARGET_CHUNK_BYTES // (cols * 4), _round_up(rows, 8)))
    chunk_rows = _round_up(chunk_rows, 8)
    # DMA block (~4 MiB): a multiple of chunk_rows, but never so large that the grid
    # collapses to one step when >= 2 are possible (keeps both v7x TensorCores busy).
    block_rows = chunk_rows * max(1, _TARGET_BLOCK_BYTES // (chunk_rows * cols * 4))
    half_rows = _round_up(pl.cdiv(rows, 2), chunk_rows)
    block_rows = max(chunk_rows, min(block_rows, half_rows))
    grid = pl.cdiv(rows, block_rows)  # ragged edge => one partial block, masked writeback

    blk = pl.BlockSpec((block_rows, cols), lambda i: (i, 0))
    kernel = functools.partial(_cv_siglog_kernel, c=c, r=r, chunk_rows=chunk_rows)

    out = pl.pallas_call(
        kernel,
        out_shape=jax.ShapeDtypeStruct((rows, cols), jnp.float32),
        grid_spec=pltpu.PrefetchScalarGridSpec(
            num_scalar_prefetch=0,
            grid=(grid,),
            in_specs=[blk],
            out_specs=blk,
        ),
        compiler_params=pltpu.CompilerParams(
            dimension_semantics=("parallel",),
            vmem_limit_bytes=_VMEM_LIMIT_BYTES,
        ),
    )(slab)

    # Re-assemble complex64 (one fused pass: strided reads of adjacent lanes).
    out_flat = out.reshape(-1)
    if pad:
        out_flat = out_flat[:flat2]
    pairs = out_flat.reshape(n, 2)
    return jax.lax.complex(pairs[:, 0], pairs[:, 1]).reshape(orig_shape)


def cv_siglog_ref(x: jax.Array, c: float = 1.0, r: float = 1.0) -> jax.Array:
    return x / (c + jnp.abs(x) / r)


if __name__ == "__main__":
    key = jax.random.PRNGKey(0)
    k_re, k_im = jax.random.split(key)
    B, C, H, W = 2, 4, 16, 16  # NCHW, matching typical PyTorch conv inputs
    re = jax.random.normal(k_re, (B, C, H, W), dtype=jnp.float32)
    im = jax.random.normal(k_im, (B, C, H, W), dtype=jnp.float32)
    x = jax.lax.complex(re, im)  # complex64

    c, r = 1.0, 1.0
    ref = cv_siglog_ref(x, c=c, r=r)

    # Force the Pallas path at this small test size (the production default falls
    # back to plain XLA below _SMALL_INPUT_ELEMS complex elements).
    out = jax.block_until_ready(cv_siglog(x, c=c, r=r, min_pallas_elems=0))
    assert out.shape == x.shape
    assert out.dtype == jnp.complex64
    assert jnp.allclose(out, ref, atol=1e-5, rtol=1e-5)

    # Small-input fallback path.
    out_fb = jax.block_until_ready(cv_siglog(x, c=c, r=r))
    assert jnp.allclose(out_fb, ref, atol=1e-5, rtol=1e-5)

    # Odd-sized input: exercises the tail-pad + partial-edge-block (masked writeback) path.
    x_odd = x.reshape(-1)[:1539]
    out_odd = jax.block_until_ready(cv_siglog(x_odd, c=c, r=r, min_pallas_elems=0))
    assert jnp.allclose(out_odd, cv_siglog_ref(x_odd, c=c, r=r), atol=1e-5, rtol=1e-5)

    print("KERNEL_OK")
</pallas_src>

<mosaic_0001>
module attributes {stable_mosaic.version = 11 : i64} {
  func.func @_cv_siglog_kernel(%arg0: i32, %arg1: memref<8x2048xf32, #tpu.memory_space<vmem>>, %arg2: memref<8x2048xf32, #tpu.memory_space<vmem>>) attributes {dimension_semantics = [#tpu.dimension_semantics<parallel>], iteration_bounds = array<i64: 1>, scalar_prefetch = 0 : i64, scratch_operands = 0 : i64, tpu.core_type = #tpu.core_type<tc>, window_params = [{transform_indices = @transform_0, window_bounds = array<i64: 8, 2048>}, {transform_indices = @transform_1, window_bounds = array<i64: 8, 2048>}]} {
    %0 = tpu.iota {dimensions = array<i32: 1>} : vector<8x2048xi32>
    %c1_i32 = arith.constant 1 : i32
    %1 = vector.broadcast %c1_i32 : i32 to vector<8x2048xi32>
    %2 = arith.andi %0, %1 : vector<8x2048xi32>
    %c0_i32 = arith.constant 0 : i32
    %3 = vector.broadcast %c0_i32 : i32 to vector<8x2048xi32>
    %4 = arith.cmpi eq, %2, %3 : vector<8x2048xi32>
    %c0_i32_0 = arith.constant 0 : i32
    %c8_i32 = arith.constant 8 : i32
    %5 = arith.muli %c0_i32_0, %c8_i32 : i32
    %6 = tpu.assume_multiple %5, 8 : i32
    %7 = arith.index_cast %6 : i32 to index
    %c0 = arith.constant 0 : index
    %8 = vector.load %arg1[%7, %c0] : memref<8x2048xf32, #tpu.memory_space<vmem>>, vector<8x2048xf32>
    %9 = arith.mulf %8, %8 : vector<8x2048xf32>
    %c2047_i32 = arith.constant 2047 : i32
    %10 = tpu.dynamic_rotate %9 by %c2047_i32 dim 1 : vector<8x2048xf32>, i32 -> vector<8x2048xf32>
    %c1_i32_1 = arith.constant 1 : i32
    %11 = tpu.dynamic_rotate %9 by %c1_i32_1 dim 1 : vector<8x2048xf32>, i32 -> vector<8x2048xf32>
    %12 = arith.select %4, %10, %11 : vector<8x2048xi1>, vector<8x2048xf32>
    %13 = arith.addf %9, %12 : vector<8x2048xf32>
    %14 = math.sqrt %13 : vector<8x2048xf32>
    %cst = arith.constant 1.000000e+00 : f32
    %15 = vector.broadcast %cst : f32 to vector<8x2048xf32>
    %16 = arith.addf %15, %14 : vector<8x2048xf32>
    %17 = tpu.reciprocal %16 : vector<8x2048xf32> -> vector<8x2048xf32>
    %cst_2 = arith.constant 1.000000e+00 : f32
    %18 = vector.broadcast %cst_2 : f32 to vector<8x2048xf32>
    %19 = arith.mulf %18, %17 : vector<8x2048xf32>
    %20 = arith.mulf %8, %19 : vector<8x2048xf32>
    %21 = arith.index_cast %6 : i32 to index
    %c0_3 = arith.constant 0 : index
    %22 = vector.load %arg2[%21, %c0_3] : memref<8x2048xf32, #tpu.memory_space<vmem>>, vector<8x2048xf32>
    tpu.vector_store %arg2[%21, %c0_3], %20 {strides = array<i32>} : memref<8x2048xf32, #tpu.memory_space<vmem>>, vector<8x2048xf32>,
    %c1_i32_4 = arith.constant 1 : i32
    return
  }
  func.func @transform_0(%arg0: i32) -> (i32, i32) {
    %c0_i32 = arith.constant 0 : i32
    %c0_i32_0 = arith.constant 0 : i32
    return %arg0, %c0_i32 : i32, i32
  }
  func.func @transform_1(%arg0: i32) -> (i32, i32) {
    %c0_i32 = arith.constant 0 : i32
    %c0_i32_0 = arith.constant 0 : i32
    return %arg0, %c0_i32 : i32, i32
  }
}

</mosaic_0001>

<bundles_post_ra>
// kernel: custom-call.1
= control target key start
LH: loop header
LB: loop body
LE: loop exit
PB: predicated region body
PF: predicated region fallthrough
CT: control target
= control target key end

     0   :  { %s59_s0 = inlined_call_operand.hbm [shape: c64[2,4,16,16], index: 0, kind: input, shape index: {}]   ;;  %s60_s1 = inlined_call_operand.vmem [shape: f32[2,4,16,16], index: 1, kind: output, shape index: {}]  }
   0x1   :  { %s2_s8 = scalar_lea.hbm %s59_s0, 2048 }
   0x2   :  { %3 = vsyncpa [#allocation0], 0  ;;  %s4_s11 = sshll.u32 %s60_s1, 4  ;;  %s34_s14 = scalar_lea.hbm %s59_s0, 4096  ;;  %s5_s11 = int_to_ptr.vmem [resolvable:$true] %s4_s11 }
   0x3   :  { %p11_p0 = scmp.ne.s32.totalorder %s2_s8, %s34_s14  ;;  %p13_p1 = scmp.lt.u32.totalorder %s2_s8, %s59_s0 }
   0x4   :  { %p14_p2 = scmp.lt.u32.totalorder %s34_s14, %s34_s14  ;;  %p16_p4 = scmp.lt.u32.totalorder %s34_s14, %s2_s8 }
   0x6   :  { %p15_p3 = por %p14_p2, %p13_p1 }
   0x8   :  { %p17_p5 = por %p16_p4, %p15_p3 }
   0xa   :  { %p18_p6 = pnand %p17_p5, %p11_p0 }
   0xc   :  { %21 = shalt.err (!%p18_p6)  }
   0xd   :  { %s22_s17 = scalar_lea.vmem %s5_s11, 2048  ;;  %p27_p8 = scmp.lt.s32.totalorder %s5_s11, %s5_s11 }
   0xe   :  { %p23_p7 = scmp.ne.s32.totalorder %s5_s11, %s22_s17  ;;  %p28_p9 = scmp.lt.s32.totalorder %s22_s17, %s22_s17 }
  0x10   :  { %p29_p10 = por %p28_p9, %p27_p8 }
  0x12   :  { %p30_p11 = pnand %p29_p10, %p23_p7 }
  0x14   :  { %33 = shalt.err (!%p30_p11)  }
  0x15   :  { %7 = dma.hbm_to_vmem [thread:$0]  %s2_s8, 2048, %s5_s11, [#allocation0] }
  0x16   :  { %35 = dma.done.wait [#allocation0], 2048  }
  0x17   :  { %36 = vsyncadd [#allocation0], 4294965248 }
  0x18   :  { %9 = vsyncpa [#allocation0], 1 }

// kernel: custom-call
= control target key start
LH: loop header
LB: loop body
LE: loop exit
PB: predicated region body
PF: predicated region fallthrough
CT: control target
= control target key end

     0   :  { %2 = vsyncpa [#allocation0], 0  ;;  %s61_s0 = inlined_call_operand.hbm [shape: c64[2,4,16,16], index: 0, kind: input, shape index: {}]   ;;  %s62_s1 = inlined_call_operand.vmem [shape: f32[2,4,16,16], index: 1, kind: output, shape index: {}]  }
   0x1   :  { %s3_s8 = sshll.u32 %s62_s1, 4  ;;  %s9_s11 = scalar_lea.hbm %s61_s0, 2048  ;;  %s4_s8 = int_to_ptr.vmem [resolvable:$true] %s3_s8 }
   0x2   :  { %p10_p0 = scmp.ne.s32.totalorder %s61_s0, %s9_s11  ;;  %s11_s16 = scalar_lea.hbm %s61_s0, 4096 }
   0x3   :  { %p12_p1 = scmp.lt.u32.totalorder %s11_s16, %s9_s11  ;;  %p13_p2 = scmp.lt.u32.totalorder %s9_s11, %s61_s0 }
   0x5   :  { %p14_p3 = por %p13_p2, %p12_p1 }
   0x7   :  { %p15_p4 = pnand %p14_p3, %p10_p0 }
   0x9   :  { %18 = shalt.err (!%p15_p4)  }
   0xa   :  { %s19_s1 = scalar_lea.vmem %s4_s8, 2048  ;;  %p24_p6 = scmp.lt.s32.totalorder %s4_s8, %s4_s8 }
   0xb   :  { %p20_p5 = scmp.ne.s32.totalorder %s4_s8, %s19_s1  ;;  %p25_p7 = scmp.lt.s32.totalorder %s19_s1, %s19_s1 }
   0xd   :  { %p26_p8 = por %p25_p7, %p24_p6 }
   0xf   :  { %p27_p9 = pnand %p26_p8, %p20_p5 }
  0x11   :  { %30 = shalt.err (!%p27_p9)  }
  0x12   :  { %6 = dma.hbm_to_vmem [thread:$0]  %s61_s0, 2048, %s4_s8, [#allocation0] }
  0x13   :  { %31 = dma.done.wait [#allocation0], 2048  }
  0x14   :  { %32 = vsyncadd [#allocation0], 4294965248 }
  0x15   :  { %8 = vsyncpa [#allocation0], 1 }

// kernel: cv_siglog.1
= control target key start
LH: loop header
LB: loop body
LE: loop exit
PB: predicated region body
PF: predicated region fallthrough
CT: control target
= control target key end

     0   :  { %v8_v0 = vlaneseq  ;;  %v802_v8 = vmov 1983009808   ;;  %s803_s30 = smov 127   ;;  %s1215_s0 = inlined_call_operand.vmem [shape: f32[2,2048], index: 0, kind: input, shape index: {}]   ;;  %s1216_s1 = inlined_call_operand.vmem [shape: f32[2,2048], index: 1, kind: output, shape index: {}]  }
   0x1   :  { %v818_v1 = vld [vmem:[%s1215_s0] sm:$0xff]  ;;  %v113_v9 = vunpack.c.l.s4 %v802_v8  ;;  %v836_v10 = vld [vmem:[%s1215_s0 + $0x8] sm:$0xff]  ;;  %v860_v28 = vld [vmem:[%s1215_s0 + $0x10] sm:$0xff] }
   0x2   :  { %v64_v2 = vld [vmem:[%s1215_s0 + $0x20] sm:$0xff]  ;;  %v831_v5 = vmul.f32 %v818_v1, %v818_v1  ;;  %v65_v11 = vld [vmem:[%s1215_s0 + $0x28] sm:$0xff]  ;;  %v116_v13 = vshrl.u32 %v8_v0, 7  ;;  %v850_v16 = vmul.f32 %v836_v10, %v836_v10  ;;  %v66_v33 = vld [vmem:[%s1215_s0 + $0x30] sm:$0xff]  ;;  %v882_v40 = vmul.f32 %v860_v28, %v860_v28 }
   0x3   :  { %v68_v3 = vld [vmem:[%s1215_s0 + $0x40] sm:$0xff]  ;;  %v80_v6 = vmul.f32 %v64_v2, %v64_v2  ;;  %v69_v14 = vld [vmem:[%s1215_s0 + $0x48] sm:$0xff]  ;;  %v81_v17 = vmul.f32 %v65_v11, %v65_v11  ;;  %v114_v19 = vunpack.c.0.s8 %v113_v9  ;;  %v70_v34 = vld [vmem:[%s1215_s0 + $0x50] sm:$0xff]  ;;  %v82_v43 = vmul.f32 %v66_v33, %v66_v33 }
   0x4   :  { %v72_v4 = vld [vmem:[%s1215_s0 + $0x60] sm:$0xff]  ;;  %v84_v7 = vmul.f32 %v68_v3, %v68_v3  ;;  %v73_v15 = vld [vmem:[%s1215_s0 + $0x68] sm:$0xff]  ;;  %v85_v21 = vmul.f32 %v69_v14, %v69_v14  ;;  %v74_v36 = vld [vmem:[%s1215_s0 + $0x70] sm:$0xff]  ;;  %v86_v44 = vmul.f32 %v70_v34, %v70_v34 }
   0x5   :  { %v88_v12 = vmul.f32 %v72_v4, %v72_v4  ;;  %v109_v18 = vcombine.high %v831_v5, %v80_v6  ;;  %v108_v20 = vcombine.low %v831_v5, %v80_v6  ;;  %v89_v24 = vmul.f32 %v73_v15, %v73_v15  ;;  %v895_v51 = vld [vmem:[%s1215_s0 + $0x18] sm:$0xff] }
   0x6   :  { %v854_v25 = vsub.s32 %v114_v19, %v116_v13  ;;  %v144_v26 = vcombine.low %v850_v16, %v81_v17  ;;  %v145_v35 = vcombine.high %v850_v16, %v81_v17  ;;  %v90_v47 = vmul.f32 %v74_v36, %v74_v36  ;;  %v67_v55 = vld [vmem:[%s1215_s0 + $0x38] sm:$0xff] }
   0x7   :  { %v111_v22 = vcombine.high %v84_v7, %v88_v12  ;;  %v110_v23 = vcombine.low %v84_v7, %v88_v12  ;;  %v146_v27 = vcombine.low %v85_v21, %v89_v24  ;;  %v147_v39 = vcombine.high %v85_v21, %v89_v24  ;;  %v71_v56 = vld [vmem:[%s1215_s0 + $0x58] sm:$0xff] }
   0x8   :  { %v125_v29 = vrot.slane %v109_v18, %v854_v25  ;;  %v118_v31 = vrot.slane %v108_v20, %v854_v25  ;;  %v154_v41 = vrot.slane %v144_v26, %v854_v25  ;;  %v161_v48 = vrot.slane %v145_v35, %v854_v25  ;;  %v75_v57 = vld [vmem:[%s1215_s0 + $0x78] sm:$0xff]  ;;  %s804_s0 = smov 1  }
   0x9   :  { %v139_v30 = vrot.slane %v111_v22, %v854_v25  ;;  %v132_v32 = vrot.slane %v110_v23, %v854_v25  ;;  %v168_v42 = vrot.slane %v146_v27, %v854_v25  ;;  %v175_v49 = vrot.slane %v147_v39, %v854_v25 }
   0xa   :  { %v180_v53 = vcombine.low %v882_v40, %v82_v43  ;;  %v182_v54 = vcombine.low %v86_v44, %v90_v47  ;;  %v181_v60 = vcombine.high %v882_v40, %v82_v43  ;;  %v183_v61 = vcombine.high %v86_v44, %v90_v47 }
   0xb   :  { %v876_v37 = vcombine.low %v125_v29, %v139_v30  ;;  %v878_v38 = vcombine.low %v118_v31, %v132_v32  ;;  %v143_v45 = vcombine.high %v125_v29, %v139_v30  ;;  %v141_v46 = vcombine.high %v118_v31, %v132_v32 }
   0xc   :  { %v177_v50 = vcombine.high %v154_v41, %v168_v42  ;;  %v176_v52 = vcombine.low %v154_v41, %v168_v42  ;;  %v179_v58 = vcombine.high %v161_v48, %v175_v49  ;;  %v178_v59 = vcombine.low %v161_v48, %v175_v49 }
   0xd   :  { %272 = vrot.lane.b32.xlu1 %v876_v37, %s803_s30  ;;  %268 = vrot.lane.b32.xlu0 %v878_v38, %s803_s30  ;;  %v912_v62 = vmul.f32 %v895_v51, %v895_v51  ;;  %v83_v63 = vmul.f32 %v67_v55, %v67_v55  ;;  %v87_v2 = vmul.f32 %v71_v56, %v71_v56  ;;  %v961_v44 = vand.u32 127, %v8_v0 }
   0xe   :  { %v190_v3 = vrot.slane %v180_v53, %v854_v25  ;;  %v204_v4 = vrot.slane %v182_v54, %v854_v25  ;;  %v91_v6 = vmul.f32 %v75_v57, %v75_v57  ;;  %v197_v7 = vrot.slane %v181_v60, %v854_v25 }
   0xf   :  { %v211_v8 = vrot.slane %v183_v61, %v854_v25  ;;  %v216_v9 = vcombine.low %v912_v62, %v83_v63  ;;  %v217_v17 = vcombine.high %v912_v62, %v83_v63  ;;  %v13_v47 = vadd.s32 512, %v961_v44 }
  0x10   :  { %v213_v11 = vcombine.high %v190_v3, %v204_v4  ;;  %v212_v12 = vcombine.low %v190_v3, %v204_v4  ;;  %v218_v13 = vcombine.low %v87_v2, %v91_v6  ;;  %v219_v20 = vcombine.high %v87_v2, %v91_v6 }
  0x11   :  { %274 = vrot.lane.b32.xlu1 %v143_v45, %s803_s30  ;;  %270 = vrot.lane.b32.xlu0 %v141_v46, %s803_s30  ;;  %v215_v14 = vcombine.high %v197_v7, %v211_v8  ;;  %v214_v15 = vcombine.low %v197_v7, %v211_v8  ;;  %v226_v18 = vrot.slane %v216_v9, %v854_v25  ;;  %v14_v48 = vadd.s32 640, %v961_v44 }
  0x12   :  { %v240_v19 = vrot.slane %v218_v13, %v854_v25  ;;  %v233_v21 = vrot.slane %v217_v17, %v854_v25  ;;  %v247_v24 = vrot.slane %v219_v20, %v854_v25  ;;  %v15_v54 = vadd.s32 768, %v961_v44 }
  0x13   :  { %v30_v53 = vand.u32 1, %v14_v48  ;;  %v16_v55 = vadd.s32 896, %v961_v44  ;;  %v11_v57 = vadd.s32 256, %v961_v44  ;;  %vm300_vm0 = vcmp.lt.s32.totalorder %v961_v44, 127 }
  0x14   :  { %v249_v22 = vcombine.high %v226_v18, %v240_v19  ;;  %v248_v23 = vcombine.low %v226_v18, %v240_v19  ;;  %v251_v26 = vcombine.high %v233_v21, %v247_v24  ;;  %v250_v27 = vcombine.low %v233_v21, %v247_v24 }
  0x15   :  { %278 = vrot.lane.b32.xlu1 %v177_v50, %s803_s30  ;;  %276 = vrot.lane.b32.xlu0 %v176_v52, %s803_s30  ;;  %vm349_vm1 = vcmp.lt.s32.totalorder %v961_v44, 1  ;;  %vm988_vm3 = vcmp.eq.s32.totalorder %v30_v53, 0  ;;  %v31_v63 = vand.u32 1, %v15_v54  ;;  %v32_v2 = vand.u32 1, %v16_v55 }
  0x16   :  { %v17_v3 = vadd.s32 1024, %v961_v44  ;;  %v18_v4 = vadd.s32 1152, %v961_v44  ;;  %v27_v6 = vand.u32 1, %v11_v57  ;;  %v21_v20 = vadd.s32 1536, %v961_v44 }
  0x17   :  { %v22_v21 = vadd.s32 1664, %v961_v44  ;;  %vm1012_vm4 = vcmp.eq.s32.totalorder %v31_v63, 0  ;;  %vm1016_vm5 = vcmp.eq.s32.totalorder %v32_v2, 0 }
  0x18   :  { %v33_v24 = vand.u32 1, %v17_v3  ;;  %vm1029_vm6 = vcmp.eq.s32.totalorder %v27_v6, 0  ;;  %v37_v61 = vand.u32 1, %v21_v20  ;;  %v23_v6 = vadd.s32 1792, %v961_v44 }
  0x19   :  { %282 = vrot.lane.b32.xlu1 %v179_v58, %s803_s30  ;;  %280 = vrot.lane.b32.xlu0 %v178_v59, %s803_s30  ;;  %v38_v63 = vand.u32 1, %v22_v21 }
  0x1a   :  { %vm1041_vm8 = vcmp.eq.s32.totalorder %v33_v24, 0  ;;  %vm1078_vm13 = vcmp.eq.s32.totalorder %v37_v61, 0 }
  0x1b   :  { %vm1082_vm14 = vcmp.eq.s32.totalorder %v38_v63, 0 }
  0x1d   :  { %286 = vrot.lane.b32.xlu1 %v213_v11, %s803_s30  ;;  %284 = vrot.lane.b32.xlu0 %v212_v12, %s803_s30 }
  0x21   :  { %290 = vrot.lane.b32.xlu1 %v215_v14, %s803_s30  ;;  %288 = vrot.lane.b32.xlu0 %v214_v15, %s803_s30 }
  0x25   :  { %294 = vrot.lane.b32.xlu1 %v249_v22, %s803_s30  ;;  %292 = vrot.lane.b32.xlu0 %v248_v23, %s803_s30 }
  0x29   :  { %298 = vrot.lane.b32.xlu1 %v251_v26, %s803_s30  ;;  %296 = vrot.lane.b32.xlu0 %v250_v27, %s803_s30 }
  0x2d   :  { %319 = vrot.lane.b32.xlu1 %v141_v46, %s804_s0  ;;  %317 = vrot.lane.b32.xlu0 %v878_v38, %s804_s0 }
  0x31   :  { %323 = vrot.lane.b32.xlu1 %v143_v45, %s804_s0  ;;  %321 = vrot.lane.b32.xlu0 %v876_v37, %s804_s0 }
  0x35   :  { %327 = vrot.lane.b32.xlu1 %v177_v50, %s804_s0  ;;  %325 = vrot.lane.b32.xlu0 %v176_v52, %s804_s0  ;;  %v29_v52 = vand.u32 1, %v13_v47 }
  0x37   :  { %vm984_vm2 = vcmp.eq.s32.totalorder %v29_v52, 0 }
  0x39   :  { %331 = vrot.lane.b32.xlu1 %v179_v58, %s804_s0  ;;  %329 = vrot.lane.b32.xlu0 %v178_v59, %s804_s0  ;;  %v12_v58 = vadd.s32 384, %v961_v44  ;;  %v10_v59 = vadd.s32 128, %v961_v44 }
  0x3b   :  { %v28_v7 = vand.u32 1, %v12_v58 }
  0x3d   :  { %335 = vrot.lane.b32.xlu1 %v213_v11, %s804_s0  ;;  %333 = vrot.lane.b32.xlu0 %v212_v12, %s804_s0  ;;  %v19_v11 = vadd.s32 1280, %v961_v44  ;;  %v20_v12 = vadd.s32 1408, %v961_v44  ;;  %vm1033_vm7 = vcmp.eq.s32.totalorder %v28_v7, 0 }
  0x3f   :  { %v35_v52 = vand.u32 1, %v19_v11  ;;  %v36_v53 = vand.u32 1, %v20_v12  ;;  %v25_v12 = vand.u32 1, %v961_v44 }
  0x41   :  { %339 = vrot.lane.b32.xlu1 %v215_v14, %s804_s0  ;;  %337 = vrot.lane.b32.xlu0 %v214_v15, %s804_s0  ;;  %vm1050_vm10 = vcmp.eq.s32.totalorder %v35_v52, 0  ;;  %vm1054_vm11 = vcmp.eq.s32.totalorder %v36_v53, 0  ;;  %vm1098_vm15 = vcmp.eq.s32.totalorder %v25_v12, 0 }
  0x45   :  { %343 = vrot.lane.b32.xlu1 %v249_v22, %s804_s0  ;;  %341 = vrot.lane.b32.xlu0 %v248_v23, %s804_s0 }
  0x49   :  { %347 = vrot.lane.b32.xlu1 %v251_v26, %s804_s0  ;;  %345 = vrot.lane.b32.xlu0 %v250_v27, %s804_s0  ;;  %v34_v26 = vand.u32 1, %v18_v4 }
  0x4b   :  { %vm1045_vm9 = vcmp.eq.s32.totalorder %v34_v26, 0 }
  0x7f   :  { %v938_v29 = vpop.permute.xlu1 %272  ;;  %v940_v30 = vpop.permute.xlu0 %268 }
  0x83   :  { %v942_v31 = vpop.permute.xlu1 %274  ;;  %v944_v32 = vpop.permute.xlu0 %270 }
  0x87   :  { %v279_v33 = vpop.permute.xlu1 %278  ;;  %v946_v34 = vpop.permute.xlu0 %276 }
  0x88   :  { %v311_v13 = vsel %vm300_vm0, %v946_v34, %v279_v33 }
  0x8b   :  { %v283_v35 = vpop.permute.xlu1 %282  ;;  %v281_v36 = vpop.permute.xlu0 %280 }
  0x8c   :  { %v310_v14 = vsel %vm300_vm0, %v279_v33, %v281_v36  ;;  %v309_v27 = vsel %vm300_vm0, %v281_v36, %v283_v35  ;;  %v26_v33 = vand.u32 1, %v10_v59  ;;  %v314_v36 = vsel %vm300_vm0, %v944_v32, %v938_v29 }
  0x8e   :  { %vm1060_vm12 = vcmp.eq.s32.totalorder %v26_v33, 0 }
  0x8f   :  { %v948_v37 = vpop.permute.xlu1 %286  ;;  %v950_v38 = vpop.permute.xlu0 %284 }
  0x90   :  { %v308_v54 = vsel %vm300_vm0, %v283_v35, %v950_v38  ;;  %v307_v20 = vsel %vm300_vm0, %v950_v38, %v948_v37 }
  0x93   :  { %v952_v39 = vpop.permute.xlu1 %290  ;;  %v954_v41 = vpop.permute.xlu0 %288 }
  0x94   :  { %v306_v21 = vsel %vm300_vm0, %v948_v37, %v954_v41  ;;  %v305_v37 = vsel %vm300_vm0, %v954_v41, %v952_v39 }
  0x97   :  { %v956_v42 = vpop.permute.xlu1 %294  ;;  %v958_v43 = vpop.permute.xlu0 %292 }
  0x98   :  { %v304_v33 = vsel %vm300_vm0, %v952_v39, %v958_v43  ;;  %v303_v61 = vsel %vm300_vm0, %v958_v43, %v956_v42 }
  0x9b   :  { %v963_v45 = vpop.permute.xlu1 %298  ;;  %v965_v46 = vpop.permute.xlu0 %296 }
  0x9c   :  { %v302_v63 = vsel %vm300_vm0, %v956_v42, %v965_v46  ;;  %v316_v11 = vsel %vm300_vm0, %v963_v45, %v940_v30 }
  0x9f   :  { %v969_v49 = vpop.permute.xlu1 %319  ;;  %v971_v50 = vpop.permute.xlu0 %317 }
  0xa3   :  { %v975_v0 = vpop.permute.xlu1 %323  ;;  %v977_v56 = vpop.permute.xlu0 %321 }
  0xa7   :  { %v328_v8 = vpop.permute.xlu1 %327  ;;  %v326_v9 = vpop.permute.xlu0 %325 }
  0xa8   :  { %v360_v15 = vsel %vm349_vm1, %v326_v9, %v328_v8  ;;  %v361_v17 = vsel %vm349_vm1, %v975_v0, %v326_v9  ;;  %v315_v9 = vsel %vm300_vm0, %v940_v30, %v944_v32 }
  0xa9   :  { %v370_v18 = vsel %vm984_vm2, %v311_v13, %v361_v17  ;;  %v371_v19 = vsel %vm988_vm3, %v310_v14, %v360_v15  ;;  %v24_v13 = vadd.s32 1920, %v961_v44 }
  0xaa   :  { %v434_v55 = vcombine.low %v370_v18, %v371_v19 }
  0xab   :  { %v332_v47 = vpop.permute.xlu1 %331  ;;  %v330_v48 = vpop.permute.xlu0 %329  ;;  %v40_v53 = vand.u32 1, %v24_v13  ;;  %v301_v13 = vsel %vm300_vm0, %v965_v46, %v963_v45 }
  0xac   :  { %v358_v57 = vsel %vm349_vm1, %v330_v48, %v332_v47  ;;  %v359_v58 = vsel %vm349_vm1, %v328_v8, %v330_v48  ;;  %v444_v15 = vrot.slane %v434_v55, %v854_v25 }
  0xad   :  { %v372_v59 = vsel %vm1012_vm4, %v309_v27, %v359_v58  ;;  %v373_v35 = vsel %vm1016_vm5, %v308_v54, %v358_v57  ;;  %v39_v27 = vand.u32 1, %v23_v6  ;;  %v362_v54 = vsel %vm349_vm1, %v977_v56, %v975_v0 }
  0xae   :  { %v436_v2 = vcombine.low %v372_v59, %v373_v35  ;;  %v363_v57 = vsel %vm349_vm1, %v969_v49, %v977_v56  ;;  %v312_v35 = vsel %vm300_vm0, %v942_v31, %v946_v34  ;;  %vm1169_vm3 = vcmp.eq.s32.totalorder %v40_v53, 0 }
  0xaf   :  { %v336_v7 = vpop.permute.xlu1 %335  ;;  %v334_v8 = vpop.permute.xlu0 %333  ;;  %vm1127_vm2 = vcmp.eq.s32.totalorder %v39_v27, 0  ;;  %v369_v6 = vsel %vm1033_vm7, %v312_v35, %v362_v54 }
  0xb0   :  { %v458_v17 = vrot.slane %v436_v2, %v854_v25  ;;  %v356_v18 = vsel %vm349_vm1, %v334_v8, %v336_v7  ;;  %v357_v19 = vsel %vm349_vm1, %v332_v47, %v334_v8 }
  0xb1   :  { %v374_v26 = vsel %vm1041_vm8, %v307_v20, %v357_v19  ;;  %v375_v38 = vsel %vm1045_vm9, %v306_v21, %v356_v18 }
  0xb2   :  { %v466_v24 = vcombine.low %v444_v15, %v458_v17  ;;  %v470_v58 = vcombine.low %v374_v26, %v375_v38 }
  0xb3   :  { %v340_v47 = vpop.permute.xlu1 %339  ;;  %v338_v48 = vpop.permute.xlu0 %337 }
  0xb4   :  { %v559_v55 = vadd.f32 %v466_v24, %v850_v16  ;;  %v354_v41 = vsel %vm349_vm1, %v338_v48, %v340_v47  ;;  %v355_v39 = vsel %vm349_vm1, %v336_v7, %v338_v48  ;;  %v313_v16 = vsel %vm300_vm0, %v938_v29, %v942_v31 }
  0xb5   :  { %v376_v59 = vsel %vm1050_vm10, %v305_v37, %v355_v39  ;;  %v377_v0 = vsel %vm1054_vm11, %v304_v33, %v354_v41  ;;  %v364_v31 = vsel %vm349_vm1, %v971_v50, %v969_v49  ;;  %v368_v4 = vsel %vm1029_vm6, %v313_v16, %v363_v57 }
  0xb6   :  { %786 = vrsqrt.f32 %v559_v55  ;;  %v472_v34 = vcombine.low %v376_v59, %v377_v0  ;;  %v480_v7 = vrot.slane %v470_v58, %v854_v25  ;;  %v367_v29 = vsel %vm1060_vm12, %v314_v36, %v364_v31 }
  0xb7   :  { %v344_v2 = vpop.permute.xlu1 %343  ;;  %v342_v3 = vpop.permute.xlu0 %341  ;;  %v400_v15 = vcombine.low %v368_v4, %v369_v6  ;;  %vm583_vm0 = vcmp.eq.f32.partialorder %v559_v55, inf  ;;  %v586_v37 = vand.u32 2147483648, %v559_v55 }
  0xb8   :  { %v352_v43 = vsel %vm349_vm1, %v342_v3, %v344_v2  ;;  %v353_v42 = vsel %vm349_vm1, %v340_v47, %v342_v3  ;;  %v494_v8 = vrot.slane %v472_v34, %v854_v25 }
  0xb9   :  { %v378_v49 = vsel %vm1078_vm13, %v303_v61, %v353_v42  ;;  %v379_v60 = vsel %vm1082_vm14, %v302_v63, %v352_v43  ;;  %v422_v26 = vrot.slane %v400_v15, %v854_v25 }
  0xba   :  { %v502_v17 = vcombine.low %v480_v7, %v494_v8  ;;  %v506_v19 = vcombine.low %v378_v49, %v379_v60 }
  0xbb   :  { %v348_v32 = vpop.permute.xlu1 %347  ;;  %v346_v18 = vpop.permute.xlu0 %345 }
  0xbc   :  { %v365_v30 = vsel %vm349_vm1, %v348_v32, %v971_v50  ;;  %v350_v20 = vsel %vm349_vm1, %v346_v18, %v348_v32  ;;  %v351_v21 = vsel %vm349_vm1, %v344_v2, %v346_v18  ;;  %v560_v45 = vadd.f32 %v502_v17, %v882_v40 }
  0xbd   :  { %v366_v46 = vsel %vm1098_vm15, %v315_v9, %v365_v30  ;;  %v380_v14 = vsel %vm1127_vm2, %v301_v13, %v351_v21  ;;  %v381_v22 = vsel %vm1169_vm3, %v316_v11, %v350_v20  ;;  %v516_v44 = vrot.slane %v506_v19, %v854_v25 }
  0xbe   :  { %v398_v23 = vcombine.low %v366_v46, %v367_v29  ;;  %v508_v24 = vcombine.low %v380_v14, %v381_v22  ;;  %788 = vrsqrt.f32 %v560_v45  ;;  %vm585_vm1 = vcmp.eq.f32.partialorder %v559_v55, 0.0 }
  0xbf   :  { %vm590_vm4 = vcmp.eq.f32.partialorder %v560_v45, inf  ;;  %vm592_vm5 = vcmp.eq.f32.partialorder %v560_v45, 0.0 }
  0xc0   :  { %v787_v50 = vpop.eup %786  ;;  %v408_v38 = vrot.slane %v398_v23, %v854_v25  ;;  %v530_v40 = vrot.slane %v508_v24, %v854_v25  ;;  %v593_v25 = vand.u32 2147483648, %v560_v45 }
  0xc1   :  { %v582_v27 = vmul.f32 %v787_v50, %v559_v55 }
  0xc2   :  { %v430_v33 = vcombine.low %v408_v38, %v422_v26  ;;  %v538_v47 = vcombine.low %v516_v44, %v530_v40 }
  0xc3   :  { %v584_v48 = vsel %vm583_vm0, %v559_v55, %v582_v27 }
  0xc4   :  { %v587_v52 = vsel %vm585_vm1, %v586_v37, %v584_v48  ;;  %v558_v53 = vadd.f32 %v430_v33, %v831_v5  ;;  %v561_v54 = vadd.f32 %v538_v47, %v912_v62 }
  0xc5   :  { %v687_v41 = vadd.f32 1.0, %v587_v52 }
  0xc6   :  { %790 = vrsqrt.f32 %v558_v53  ;;  %vm576_vm6 = vcmp.eq.f32.partialorder %v558_v53, inf  ;;  %v579_v62 = vand.u32 2147483648, %v558_v53  ;;  %vm578_vm7 = vcmp.eq.f32.partialorder %v558_v53, 0.0 }
  0xc7   :  { %792 = vrcp.f32 %v687_v41  ;;  %vm597_vm8 = vcmp.eq.f32.partialorder %v561_v54, inf  ;;  %v600_v34 = vand.u32 2147483648, %v561_v54  ;;  %vm599_vm9 = vcmp.eq.f32.partialorder %v561_v54, 0.0 }
  0xc8   :  { %794 = vrsqrt.f32 %v561_v54  ;;  %v789_v39 = vpop.eup %788 }
  0xc9   :  { %v589_v57 = vmul.f32 %v789_v39, %v560_v45 }
  0xcb   :  { %v591_v58 = vsel %vm590_vm4, %v560_v45, %v589_v57 }
  0xcc   :  { %v594_v59 = vsel %vm592_vm5, %v593_v25, %v591_v58 }
  0xcd   :  { %v688_v0 = vadd.f32 1.0, %v594_v59 }
  0xcf   :  { %796 = vrcp.f32 %v688_v0 }
  0xd0   :  { %v791_v16 = vpop.eup %790 }
  0xd1   :  { %v793_v55 = vpop.eup %792  ;;  %v575_v35 = vmul.f32 %v791_v16, %v558_v53 }
  0xd2   :  { %v795_v56 = vpop.eup %794  ;;  %v719_v5 = vmul.f32 %v793_v55, %v836_v10 }
  0xd3   :  { %v577_v61 = vsel %vm576_vm6, %v558_v53, %v575_v35  ;;  %v596_v63 = vmul.f32 %v795_v56, %v561_v54 }
  0xd4   :  { %769 = vst [vmem:[%s1216_s1 + $0x8] sm:$0xff] %v719_v5  ;;  %v580_v31 = vsel %vm578_vm7, %v579_v62, %v577_v61 }
  0xd5   :  { %v686_v2 = vadd.f32 1.0, %v580_v31  ;;  %v598_v3 = vsel %vm597_vm8, %v561_v54, %v596_v63 }
  0xd6   :  { %v601_v4 = vsel %vm599_vm9, %v600_v34, %v598_v3 }
  0xd7   :  { %798 = vrcp.f32 %v686_v2  ;;  %v689_v6 = vadd.f32 1.0, %v601_v4 }
  0xd9   :  { %800 = vrcp.f32 %v689_v6  ;;  %v797_v10 = vpop.eup %796 }
  0xda   :  { %v720_v43 = vmul.f32 %v797_v10, %v860_v28 }
  0xdc   :  { %771 = vst [vmem:[%s1216_s1 + $0x10] sm:$0xff] %v720_v43 }
  0xe1   :  { %v799_v42 = vpop.eup %798 }
  0xe2   :  { %v718_v7 = vmul.f32 %v799_v42, %v818_v1 }
  0xe3   :  { %v801_v8 = vpop.eup %800 }
  0xe4   :  { %767 = vst [vmem:[%s1216_s1] sm:$0xff] %v718_v7  ;;  %v721_v49 = vmul.f32 %v801_v8, %v895_v51 }
  0xe6   :  { %773 = vst [vmem:[%s1216_s1 + $0x18] sm:$0xff] %v721_v49 }

// kernel: custom-call.2
= control target key start
LH: loop header
LB: loop body
LE: loop exit
PB: predicated region body
PF: predicated region fallthrough
CT: control target
= control target key end

     0   :  { %s126_s0 = inlined_call_operand.vmem [shape: f32[2,4,16,16], index: 0, kind: input, shape index: {}]   ;;  %s127_s1 = inlined_call_operand.vmem [shape: f32[2,4,16,16], index: 1, kind: input, shape index: {}]   ;;  %s128_s2 = inlined_call_operand.hbm [shape: c64[2,4,16,16], index: 2, kind: output, shape index: {}]  }
   0x1   :  { %s87_s11 = scalar_lea.hbm %s128_s2, 2048 }
   0x2   :  { %4 = vsyncpa [#allocation0], 0  ;;  %s5_s14 = sshll.u32 %s126_s0, 4  ;;  %s6_s14 = int_to_ptr.vmem [resolvable:$true] %s5_s14 }
   0x3   :  { %s18_s15 = scalar_lea.vmem %s6_s14, 2048  ;;  %p23_p1 = scmp.lt.s32.totalorder %s6_s14, %s6_s14 }
   0x4   :  { %p19_p0 = scmp.ne.s32.totalorder %s6_s14, %s18_s15  ;;  %p24_p2 = scmp.lt.s32.totalorder %s18_s15, %s18_s15 }
   0x6   :  { %p25_p3 = por %p24_p2, %p23_p1 }
   0x8   :  { %p26_p4 = pnand %p25_p3, %p19_p0 }
   0xa   :  { %29 = shalt.err (!%p26_p4)  }
   0xb   :  { %p31_p5 = scmp.ne.s32.totalorder %s128_s2, %s87_s11  ;;  %s32_s0 = scalar_lea.hbm %s128_s2, 4096 }
   0xc   :  { %p33_p6 = scmp.lt.u32.totalorder %s32_s0, %s87_s11  ;;  %p34_p7 = scmp.lt.u32.totalorder %s87_s11, %s128_s2 }
   0xe   :  { %p35_p8 = por %p34_p7, %p33_p6 }
  0x10   :  { %p36_p9 = pnand %p35_p8, %p31_p5 }
  0x12   :  { %39 = shalt.err (!%p36_p9)  }
  0x13   :  { %8 = dma.vmem_to_hbm [thread:$0]  %s6_s14, 2048, %s128_s2, [#allocation0] }
  0x14   :  { %65 = dma.done.wait [#allocation0], 2048  }
  0x15   :  { %66 = vsyncadd [#allocation0], 4294965248 }
  0x16   :  { %10 = vsyncpa [#allocation0], 1 }
  0x17   :  { %11 = vsyncpa [#allocation1], 0  ;;  %s12_s28 = sshll.u32 %s127_s1, 4  ;;  %s13_s28 = int_to_ptr.vmem [resolvable:$true] %s12_s28 }
  0x18   :  { %s40_s29 = scalar_lea.vmem %s13_s28, 2048  ;;  %p45_p11 = scmp.lt.s32.totalorder %s13_s28, %s13_s28 }
  0x19   :  { %p41_p10 = scmp.ne.s32.totalorder %s13_s28, %s40_s29  ;;  %p46_p12 = scmp.lt.s32.totalorder %s40_s29, %s40_s29 }
  0x1b   :  { %p47_p13 = por %p46_p12, %p45_p11 }
  0x1d   :  { %p48_p0 = pnand %p47_p13, %p41_p10 }
  0x1f   :  { %51 = shalt.err (!%p48_p0)  }
  0x20   :  { %p53_p1 = scmp.ne.s32.totalorder %s87_s11, %s32_s0  ;;  %p56_p2 = scmp.lt.u32.totalorder %s32_s0, %s32_s0 }
  0x22   :  { %p57_p3 = por %p56_p2, %p34_p7 }
  0x24   :  { %p59_p4 = por %p57_p3, %p33_p6 }
  0x26   :  { %p60_p5 = pnand %p59_p4, %p53_p1 }
  0x28   :  { %63 = shalt.err (!%p60_p5)  }
  0x29   :  { %15 = dma.vmem_to_hbm [thread:$0]  %s13_s28, 2048, %s87_s11, [#allocation1] }
  0x2a   :  { %67 = dma.done.wait [#allocation1], 2048  }
  0x2b   :  { %68 = vsyncadd [#allocation1], 4294965248 }
  0x2c   :  { %17 = vsyncpa [#allocation1], 1 }

</bundles_post_ra>
